<compile_context>
chip_gen: v5e
topology: v5e:2x2
jax: 0.10.0
libtpu: 0.0.40
codegen_flags: <defaults>
</compile_context>

<pallas_src>
import functools

import jax
import jax.numpy as jnp
import numpy as np
from jax.experimental import pallas as pl
from jax.experimental.pallas import tpu as pltpu


def _round_up(x, m):
    return (x + m - 1) // m * m


def bidaf_attention_kernel(c_ref, q_ref, c_mask_ref, q_mask_ref,
                           c_w_ref, q_w_ref, cq_w_ref, bias_ref,
                           out_ref, *, h_p):
    # Per-batch views.
    c_f32 = c_ref[0]                      # (c_len_p, h_p) f32 (exact c)
    q_bf = q_ref[0]                       # (q_len_p, h_p) bf16 (MXU operand)
    c_bf = c_f32.astype(jnp.bfloat16)     # bf16 copy for the MXU
    cm = c_mask_ref[0]                    # (c_len_p, 1) f32
    qm = q_mask_ref[0]                    # (1, q_len_p) f32
    c_w = c_w_ref[...]                    # (1, h_p) f32
    q_w = q_w_ref[...]                    # (1, h_p) f32
    cq_w = cq_w_ref[...]                  # (1, h_p) f32
    bias = bias_ref[0, 0]                 # scalar (SMEM)

    # ---- similarity matrix s : (c_len_p, q_len_p) ----
    # s0: VPU lane reduction; scalar bias folded in (no full-matrix add pass).
    s0 = jnp.sum(c_f32 * c_w, axis=1, keepdims=True) + bias            # (c_len, 1)
    # s1: (1,H)x(q_len,H)->(1,q_len); result is already a row vector.
    s1_row = jax.lax.dot_general(
        q_w.astype(jnp.bfloat16), q_bf,
        (((1,), (1,)), ((), ())),
        preferred_element_type=jnp.float32)                            # (1, q_len)
    # s2: contracted dot_general (no explicit q.T materialization).
    ccq_bf = (c_f32 * cq_w).astype(jnp.bfloat16)
    s2 = jax.lax.dot_general(
        ccq_bf, q_bf,
        (((1,), (1,)), ((), ())),
        preferred_element_type=jnp.float32)                            # (c_len, q_len)
    s = s2 + s0 + s1_row

    neg = jnp.float32(-1e30)

    # ---- masked softmax over c dimension (torch dim=1) FIRST, so its
    # temporaries (e_c, p2, qa) die before the q-softmax / output matmuls.
    logits_c = jnp.where(cm > 0.0, s, neg)
    m_c = jnp.max(logits_c, axis=0, keepdims=True)
    e_c = jnp.exp(logits_c - m_c)
    # Exact division on this path: its error compounds through two matmuls (b).
    p2_bf = (e_c / jnp.sum(e_c, axis=0, keepdims=True)).astype(jnp.bfloat16)
    # qa = p2^T @ c (contract over c_len): reassociation of (p1 @ p2^T) @ c.
    qa_bf = jax.lax.dot_general(
        p2_bf, c_bf, (((0,), (0,)), ((), ())),
        preferred_element_type=jnp.float32).astype(jnp.bfloat16)       # (q_len, h_p)

    # ---- masked softmax over q dimension (torch dim=2) ----
    logits_q = jnp.where(qm > 0.0, s, neg)
    m_q = jnp.max(logits_q, axis=1, keepdims=True)
    e_q = jnp.exp(logits_q - m_q)
    p1_bf = (e_q * pl.reciprocal(jnp.sum(e_q, axis=1, keepdims=True),
                                 approx=True)).astype(jnp.bfloat16)

    # ---- attention outputs ----
    a = jnp.dot(p1_bf, q_bf, preferred_element_type=jnp.float32)       # (c_len, h_p)
    b = jnp.dot(p1_bf, qa_bf, preferred_element_type=jnp.float32)      # (c_len, h_p)

    # Fused output slab: four lane-dense chunks at 128-aligned column offsets.
    # TODO(synk): emit bf16 here (halves writeback) if downstream accepts it.
    out_ref[0, :, 0 * h_p:1 * h_p] = c_f32
    out_ref[0, :, 1 * h_p:2 * h_p] = a
    out_ref[0, :, 2 * h_p:3 * h_p] = c_f32 * a
    out_ref[0, :, 3 * h_p:4 * h_p] = c_f32 * b


def _vmem_limit_bytes(c_len_p, q_len_p, h_p):
    """Size the scoped-VMEM limit from the actual block shapes (with headroom)."""
    f32, bf16 = 4, 2
    in_blk = (c_len_p * h_p * f32            # c block (f32)
              + q_len_p * h_p * bf16         # q block (bf16)
              + c_len_p * f32                # c_mask
              + q_len_p * f32                # q_mask
              + 3 * h_p * f32)               # weight rows
    out_blk = c_len_p * 4 * h_p * f32        # fused output slab
    temps = (8 * c_len_p * q_len_p * f32     # s / logits / e / p temporaries
             + 4 * c_len_p * h_p * f32       # c_bf, a, b, elementwise products
             + 2 * q_len_p * h_p * f32)      # qa
    need = 2 * (in_blk + out_blk) + temps    # double-buffered I/O + live temps
    # >=32 MiB so the compiler isn't starved; <=64 MiB keeps it safe on v7x
    # (64 MiB physical). On v6e (128 MiB physical) this can be raised to ~96 MiB
    # for very long contexts.
    return int(min(max(need * 3 // 2, 32 * 1024 * 1024), 64 * 1024 * 1024))


def bidaf_attention(c, q, c_mask, q_mask, c_weight, q_weight, cq_weight, bias):
    """c: (B, c_len, H), q: (B, q_len, H); masks: (B, c_len)/(B, q_len) float 0/1."""
    B, c_len, H = c.shape
    q_len = q.shape[1]

    # Lane/sublane-dense padding (zeros; masks zero the padded positions so the
    # softmaxes are unaffected as long as each row/column has a valid token).
    c_len_p = _round_up(c_len, 16)       # 16: bf16 sublane packing for c_bf
    q_len_p = _round_up(q_len, 128)
    h_p = _round_up(H, 128)

    c_f32 = jnp.pad(c.astype(jnp.float32),
                    ((0, 0), (0, c_len_p - c_len), (0, h_p - H)))
    q_bf = jnp.pad(q.astype(jnp.bfloat16),
                   ((0, 0), (0, q_len_p - q_len), (0, h_p - H)))
    c_mask_p = jnp.pad(c_mask.astype(jnp.float32),
                       ((0, 0), (0, c_len_p - c_len)))[..., None]      # (B, c_len_p, 1)
    q_mask_p = jnp.pad(q_mask.astype(jnp.float32),
                       ((0, 0), (0, q_len_p - q_len)))[:, None, :]     # (B, 1, q_len_p)

    c_w_row = jnp.pad(c_weight.reshape(1, H).astype(jnp.float32),
                      ((0, 0), (0, h_p - H)))
    q_w_row = jnp.pad(q_weight.reshape(1, H).astype(jnp.float32),
                      ((0, 0), (0, h_p - H)))
    cq_w_row = jnp.pad(cq_weight.reshape(1, H).astype(jnp.float32),
                       ((0, 0), (0, h_p - H)))
    bias2d = bias.reshape(1, 1).astype(jnp.float32)

    kernel = functools.partial(bidaf_attention_kernel, h_p=h_p)

    grid_spec = pltpu.PrefetchScalarGridSpec(
        num_scalar_prefetch=0,
        grid=(B,),
        in_specs=[
            pl.BlockSpec((1, c_len_p, h_p), lambda b: (b, 0, 0)),      # c (f32)
            pl.BlockSpec((1, q_len_p, h_p), lambda b: (b, 0, 0)),      # q (bf16)
            pl.BlockSpec((1, c_len_p, 1), lambda b: (b, 0, 0)),        # c_mask
            pl.BlockSpec((1, 1, q_len_p), lambda b: (b, 0, 0)),        # q_mask
            pl.BlockSpec((1, h_p), lambda b: (0, 0)),                  # c_weight row
            pl.BlockSpec((1, h_p), lambda b: (0, 0)),                  # q_weight row
            pl.BlockSpec((1, h_p), lambda b: (0, 0)),                  # cq_weight row
            pl.BlockSpec(memory_space=pltpu.MemorySpace.SMEM),         # bias scalar
        ],
        out_specs=pl.BlockSpec((1, c_len_p, 4 * h_p), lambda b: (b, 0, 0)),
    )

    slab = pl.pallas_call(
        kernel,
        out_shape=jax.ShapeDtypeStruct((B, c_len_p, 4 * h_p), jnp.float32),
        grid_spec=grid_spec,
        compiler_params=pltpu.CompilerParams(
            dimension_semantics=("parallel",),
            vmem_limit_bytes=_vmem_limit_bytes(c_len_p, q_len_p, h_p)),
    )(c_f32, q_bf, c_mask_p, q_mask_p, c_w_row, q_w_row, cq_w_row, bias2d)

    # If the logical shapes are already lane/sublane aligned the slab IS the
    # result (zero extra passes). Otherwise one de-pad slice remains.
    out = slab
    if c_len_p != c_len:
        out = out[:, :c_len, :]
    if h_p != H:
        out = out.reshape(B, c_len, 4, h_p)[:, :, :, :H].reshape(B, c_len, 4 * H)
    return out


def _reference(c, q, c_mask, q_mask, c_weight, q_weight, cq_weight, bias):
    """Plain-JAX reference mirroring the PyTorch forward (eval mode)."""
    B, c_len, H = c.shape
    q_len = q.shape[1]
    s0 = jnp.matmul(c, c_weight)                                   # (B, c_len, 1)
    s1 = jnp.swapaxes(jnp.matmul(q, q_weight), 1, 2)               # (B, 1, q_len)
    s2 = jnp.matmul(c * cq_weight, jnp.swapaxes(q, 1, 2))          # (B, c_len, q_len)
    s = s0 + s1 + s2 + bias
    qm = q_mask.reshape(B, 1, q_len)
    cm = c_mask.reshape(B, c_len, 1)
    p1 = jax.nn.softmax(qm * s + (1.0 - qm) * (-1e30), axis=2)
    p2 = jax.nn.softmax(cm * s + (1.0 - cm) * (-1e30), axis=1)
    a = jnp.matmul(p1, q)
    b = jnp.matmul(jnp.matmul(p1, jnp.swapaxes(p2, 1, 2)), c)
    return jnp.concatenate([c, a, c * a, c * b], axis=2)


def _xavier_uniform(key, shape):
    rf = 1
    for d in shape[2:]:
        rf *= d
    fan_in = shape[1] * rf
    fan_out = shape[0] * rf
    bound = float(np.sqrt(6.0 / (fan_in + fan_out)))
    return jax.random.uniform(key, shape, jnp.float32, minval=-bound, maxval=bound)


if __name__ == "__main__":
    B, c_len, q_len, hidden = 2, 16, 8, 32

    key = jax.random.PRNGKey(0)
    k_c, k_q, k_cw, k_qw, k_cqw = jax.random.split(key, 5)

    c = jax.random.normal(k_c, (B, c_len, hidden), jnp.float32)
    q = jax.random.normal(k_q, (B, q_len, hidden), jnp.float32)

    # Masks: 1.0 for valid positions, 0.0 for padding (last few positions padded).
    c_valid = jnp.array([c_len, c_len - 3], jnp.int32)
    q_valid = jnp.array([q_len, q_len - 2], jnp.int32)
    c_mask = (jnp.arange(c_len)[None, :] < c_valid[:, None]).astype(jnp.float32)
    q_mask = (jnp.arange(q_len)[None, :] < q_valid[:, None]).astype(jnp.float32)

    # Deterministic parameter init (xavier uniform, like the module's __init__).
    c_weight = _xavier_uniform(k_cw, (hidden, 1))
    q_weight = _xavier_uniform(k_qw, (hidden, 1))
    cq_weight = _xavier_uniform(k_cqw, (1, 1, hidden))
    bias = jnp.zeros((1,), jnp.float32)

    out = bidaf_attention(c, q, c_mask, q_mask, c_weight, q_weight, cq_weight, bias)
    out = jax.block_until_ready(out)

    ref = _reference(c, q, c_mask, q_mask, c_weight, q_weight, cq_weight, bias)
    ref = jax.block_until_ready(ref)

    assert out.shape == (B, c_len, 4 * hidden), out.shape
    np.testing.assert_allclose(np.asarray(out), np.asarray(ref), rtol=2e-2, atol=2e-2)

    print("KERNEL_OK")
</pallas_src>

<mosaic_0001>
module attributes {stable_mosaic.version = 11 : i64} {
  func.func @bidaf_attention_kernel(%arg0: i32, %arg1: memref<1x16x128xf32, #tpu.memory_space<vmem>>, %arg2: memref<1x128x128xbf16, #tpu.memory_space<vmem>>, %arg3: memref<1x16x1xf32, #tpu.memory_space<vmem>>, %arg4: memref<1x1x128xf32, #tpu.memory_space<vmem>>, %arg5: memref<1x128xf32, #tpu.memory_space<vmem>>, %arg6: memref<1x128xf32, #tpu.memory_space<vmem>>, %arg7: memref<1x128xf32, #tpu.memory_space<vmem>>, %arg8: memref<1x1xf32, #tpu.memory_space<smem>>, %arg9: memref<1x16x512xf32, #tpu.memory_space<vmem>>) attributes {dimension_semantics = [#tpu.dimension_semantics<parallel>], iteration_bounds = array<i64: 2>, scalar_prefetch = 0 : i64, scratch_operands = 0 : i64, tpu.core_type = #tpu.core_type<tc>, window_params = [{transform_indices = @transform_0, window_bounds = array<i64: 1, 16, 128>}, {transform_indices = @transform_1, window_bounds = array<i64: 1, 128, 128>}, {transform_indices = @transform_2, window_bounds = array<i64: 1, 16, 1>}, {transform_indices = @transform_3, window_bounds = array<i64: 1, 1, 128>}, {pipeline_mode = #tpu.pipeline_mode<synchronous>, transform_indices = @transform_4, window_bounds = array<i64: 1, 128>}, {pipeline_mode = #tpu.pipeline_mode<synchronous>, transform_indices = @transform_5, window_bounds = array<i64: 1, 128>}, {pipeline_mode = #tpu.pipeline_mode<synchronous>, transform_indices = @transform_6, window_bounds = array<i64: 1, 128>}, {transform_indices = @transform_7, window_bounds = array<i64: 1, 1>}, {transform_indices = @transform_8, window_bounds = array<i64: 1, 16, 512>}]} {
    %c0 = arith.constant 0 : index
    %c0_0 = arith.constant 0 : index
    %c0_1 = arith.constant 0 : index
    %0 = vector.load %arg1[%c0, %c0_0, %c0_1] : memref<1x16x128xf32, #tpu.memory_space<vmem>>, vector<1x16x128xf32>
    %1 = vector.shape_cast %0 : vector<1x16x128xf32> to vector<16x128xf32>
    %c0_2 = arith.constant 0 : index
    %c0_3 = arith.constant 0 : index
    %c0_4 = arith.constant 0 : index
    %2 = vector.load %arg2[%c0_2, %c0_3, %c0_4] : memref<1x128x128xbf16, #tpu.memory_space<vmem>>, vector<1x128x128xbf16>
    %3 = vector.shape_cast %2 : vector<1x128x128xbf16> to vector<128x128xbf16>
    %4 = arith.truncf %1 : vector<16x128xf32> to vector<16x128xbf16>
    %c0_5 = arith.constant 0 : index
    %c0_6 = arith.constant 0 : index
    %c0_7 = arith.constant 0 : index
    %5 = vector.load %arg3[%c0_5, %c0_6, %c0_7] : memref<1x16x1xf32, #tpu.memory_space<vmem>>, vector<1x16x1xf32>
    %6 = vector.shape_cast %5 : vector<1x16x1xf32> to vector<16x1xf32>
    %c0_8 = arith.constant 0 : index
    %c0_9 = arith.constant 0 : index
    %c0_10 = arith.constant 0 : index
    %7 = vector.load %arg4[%c0_8, %c0_9, %c0_10] : memref<1x1x128xf32, #tpu.memory_space<vmem>>, vector<1x1x128xf32>
    %8 = vector.shape_cast %7 : vector<1x1x128xf32> to vector<1x128xf32>
    %c0_11 = arith.constant 0 : index
    %c0_12 = arith.constant 0 : index
    %9 = vector.load %arg5[%c0_11, %c0_12] : memref<1x128xf32, #tpu.memory_space<vmem>>, vector<1x128xf32>
    %c0_13 = arith.constant 0 : index
    %c0_14 = arith.constant 0 : index
    %10 = vector.load %arg6[%c0_13, %c0_14] : memref<1x128xf32, #tpu.memory_space<vmem>>, vector<1x128xf32>
    %c0_15 = arith.constant 0 : index
    %c0_16 = arith.constant 0 : index
    %11 = vector.load %arg7[%c0_15, %c0_16] : memref<1x128xf32, #tpu.memory_space<vmem>>, vector<1x128xf32>
    %c0_17 = arith.constant 0 : index
    %c0_18 = arith.constant 0 : index
    %12 = memref.load %arg8[%c0_17, %c0_18] : memref<1x1xf32, #tpu.memory_space<smem>>
    %13 = vector.broadcast %9 : vector<1x128xf32> to vector<16x128xf32>
    %14 = arith.mulf %1, %13 : vector<16x128xf32>
    %cst = arith.constant dense<0.000000e+00> : vector<16xf32>
    %15 = vector.multi_reduction <add>, %14, %cst [1] : vector<16x128xf32> to vector<16xf32>
    %16 = vector.shape_cast %15 : vector<16xf32> to vector<16x1xf32>
    %17 = vector.broadcast %12 : f32 to vector<16x1xf32>
    %18 = arith.addf %16, %17 : vector<16x1xf32>
    %19 = arith.truncf %10 : vector<1x128xf32> to vector<1x128xbf16>
    %cst_19 = arith.constant dense<0.000000e+00> : vector<1x128xf32>
    %20 = tpu.matmul %19, %3, %cst_19 {dimension_numbers = #tpu.dot_dimension_numbers<[1], [1], [0], [0], [0, 0, 1, 0], [], []>} : vector<1x128xbf16>, vector<128x128xbf16>, vector<1x128xf32> -> vector<1x128xf32>
    %21 = vector.broadcast %11 : vector<1x128xf32> to vector<16x128xf32>
    %22 = arith.mulf %1, %21 : vector<16x128xf32>
    %23 = arith.truncf %22 : vector<16x128xf32> to vector<16x128xbf16>
    %cst_20 = arith.constant dense<0.000000e+00> : vector<16x128xf32>
    %24 = tpu.matmul %23, %3, %cst_20 {dimension_numbers = #tpu.dot_dimension_numbers<[1], [1], [0], [0], [0, 0, 1, 0], [], []>} : vector<16x128xbf16>, vector<128x128xbf16>, vector<16x128xf32> -> vector<16x128xf32>
    %25 = vector.broadcast %18 : vector<16x1xf32> to vector<16x128xf32>
    %26 = arith.addf %24, %25 : vector<16x128xf32>
    %27 = vector.broadcast %20 : vector<1x128xf32> to vector<16x128xf32>
    %28 = arith.addf %26, %27 : vector<16x128xf32>
    %cst_21 = arith.constant 0.000000e+00 : f32
    %29 = vector.broadcast %cst_21 : f32 to vector<16x1xf32>
    %30 = arith.cmpf ogt, %6, %29 : vector<16x1xf32>
    %cst_22 = arith.constant -1.000000e+30 : f32
    %31 = vector.shape_cast %30 : vector<16x1xi1> to vector<16x1xi1>
    %32 = vector.broadcast %31 : vector<16x1xi1> to vector<16x128xi1>
    %33 = vector.broadcast %cst_22 : f32 to vector<16x128xf32>
    %34 = arith.select %32, %28, %33 : vector<16x128xi1>, vector<16x128xf32>
    %cst_23 = arith.constant dense<0xFF800000> : vector<128xf32>
    %35 = vector.multi_reduction <maximumf>, %34, %cst_23 [0] : vector<16x128xf32> to vector<128xf32>
    %36 = vector.shape_cast %35 : vector<128xf32> to vector<1x128xf32>
    %37 = vector.broadcast %36 : vector<1x128xf32> to vector<16x128xf32>
    %38 = arith.subf %34, %37 : vector<16x128xf32>
    %39 = math.exp %38 : vector<16x128xf32>
    %cst_24 = arith.constant dense<0.000000e+00> : vector<128xf32>
    %40 = vector.multi_reduction <add>, %39, %cst_24 [0] : vector<16x128xf32> to vector<128xf32>
    %41 = vector.shape_cast %40 : vector<128xf32> to vector<1x128xf32>
    %42 = vector.broadcast %41 : vector<1x128xf32> to vector<16x128xf32>
    %43 = arith.divf %39, %42 : vector<16x128xf32>
    %44 = arith.truncf %43 : vector<16x128xf32> to vector<16x128xbf16>
    %cst_25 = arith.constant dense<0.000000e+00> : vector<128x128xf32>
    %45 = tpu.matmul %44, %4, %cst_25 {dimension_numbers = #tpu.dot_dimension_numbers<[0], [0], [1], [1], [0, 1, 1, 1], [], []>} : vector<16x128xbf16>, vector<16x128xbf16>, vector<128x128xf32> -> vector<128x128xf32>
    %46 = arith.truncf %45 : vector<128x128xf32> to vector<128x128xbf16>
    %cst_26 = arith.constant 0.000000e+00 : f32
    %47 = vector.broadcast %cst_26 : f32 to vector<1x128xf32>
    %48 = arith.cmpf ogt, %8, %47 : vector<1x128xf32>
    %cst_27 = arith.constant -1.000000e+30 : f32
    %49 = vector.shape_cast %48 : vector<1x128xi1> to vector<1x128xi1>
    %50 = vector.broadcast %49 : vector<1x128xi1> to vector<16x128xi1>
    %51 = vector.broadcast %cst_27 : f32 to vector<16x128xf32>
    %52 = arith.select %50, %28, %51 : vector<16x128xi1>, vector<16x128xf32>
    %cst_28 = arith.constant dense<0xFF800000> : vector<16xf32>
    %53 = vector.multi_reduction <maximumf>, %52, %cst_28 [1] : vector<16x128xf32> to vector<16xf32>
    %54 = vector.shape_cast %53 : vector<16xf32> to vector<16x1xf32>
    %55 = vector.broadcast %54 : vector<16x1xf32> to vector<16x128xf32>
    %56 = arith.subf %52, %55 : vector<16x128xf32>
    %57 = math.exp %56 : vector<16x128xf32>
    %cst_29 = arith.constant dense<0.000000e+00> : vector<16xf32>
    %58 = vector.multi_reduction <add>, %57, %cst_29 [1] : vector<16x128xf32> to vector<16xf32>
    %59 = vector.shape_cast %58 : vector<16xf32> to vector<16x1xf32>
    %60 = tpu.reciprocal %59 {approx = true} : vector<16x1xf32> -> vector<16x1xf32>
    %61 = vector.broadcast %60 : vector<16x1xf32> to vector<16x128xf32>
    %62 = arith.mulf %57, %61 : vector<16x128xf32>
    %63 = arith.truncf %62 : vector<16x128xf32> to vector<16x128xbf16>
    %cst_30 = arith.constant dense<0.000000e+00> : vector<16x128xf32>
    %64 = tpu.matmul %63, %3, %cst_30 {dimension_numbers = #tpu.dot_dimension_numbers<[1], [0], [0], [1], [0, 0, 1, 1], [], []>} : vector<16x128xbf16>, vector<128x128xbf16>, vector<16x128xf32> -> vector<16x128xf32>
    %cst_31 = arith.constant dense<0.000000e+00> : vector<16x128xf32>
    %65 = tpu.matmul %63, %46, %cst_31 {dimension_numbers = #tpu.dot_dimension_numbers<[1], [0], [0], [1], [0, 0, 1, 1], [], []>} : vector<16x128xbf16>, vector<128x128xbf16>, vector<16x128xf32> -> vector<16x128xf32>
    %c0_32 = arith.constant 0 : index
    %c0_33 = arith.constant 0 : index
    %c0_34 = arith.constant 0 : index
    %66 = vector.load %arg9[%c0_32, %c0_33, %c0_34] : memref<1x16x512xf32, #tpu.memory_space<vmem>>, vector<1x16x128xf32>
    %67 = vector.shape_cast %66 : vector<1x16x128xf32> to vector<16x128xf32>
    %68 = vector.shape_cast %1 : vector<16x128xf32> to vector<1x16x128xf32>
    tpu.vector_store %arg9[%c0_32, %c0_33, %c0_34], %68 {strides = array<i32>} : memref<1x16x512xf32, #tpu.memory_space<vmem>>, vector<1x16x128xf32>,
    %c0_35 = arith.constant 0 : index
    %c0_36 = arith.constant 0 : index
    %c128 = arith.constant 128 : index
    %69 = vector.load %arg9[%c0_35, %c0_36, %c128] : memref<1x16x512xf32, #tpu.memory_space<vmem>>, vector<1x16x128xf32>
    %70 = vector.shape_cast %69 : vector<1x16x128xf32> to vector<16x128xf32>
    %71 = vector.shape_cast %64 : vector<16x128xf32> to vector<1x16x128xf32>
    tpu.vector_store %arg9[%c0_35, %c0_36, %c128], %71 {strides = array<i32>} : memref<1x16x512xf32, #tpu.memory_space<vmem>>, vector<1x16x128xf32>,
    %72 = arith.mulf %1, %64 : vector<16x128xf32>
    %c0_37 = arith.constant 0 : index
    %c0_38 = arith.constant 0 : index
    %c256 = arith.constant 256 : index
    %73 = vector.load %arg9[%c0_37, %c0_38, %c256] : memref<1x16x512xf32, #tpu.memory_space<vmem>>, vector<1x16x128xf32>
    %74 = vector.shape_cast %73 : vector<1x16x128xf32> to vector<16x128xf32>
    %75 = vector.shape_cast %72 : vector<16x128xf32> to vector<1x16x128xf32>
    tpu.vector_store %arg9[%c0_37, %c0_38, %c256], %75 {strides = array<i32>} : memref<1x16x512xf32, #tpu.memory_space<vmem>>, vector<1x16x128xf32>,
    %76 = arith.mulf %1, %65 : vector<16x128xf32>
    %c0_39 = arith.constant 0 : index
    %c0_40 = arith.constant 0 : index
    %c384 = arith.constant 384 : index
    %77 = vector.load %arg9[%c0_39, %c0_40, %c384] : memref<1x16x512xf32, #tpu.memory_space<vmem>>, vector<1x16x128xf32>
    %78 = vector.shape_cast %77 : vector<1x16x128xf32> to vector<16x128xf32>
    %79 = vector.shape_cast %76 : vector<16x128xf32> to vector<1x16x128xf32>
    tpu.vector_store %arg9[%c0_39, %c0_40, %c384], %79 {strides = array<i32>} : memref<1x16x512xf32, #tpu.memory_space<vmem>>, vector<1x16x128xf32>,
    return
  }
  func.func @transform_0(%arg0: i32) -> (i32, i32, i32) {
    %c0_i32 = arith.constant 0 : i32
    %c0_i32_0 = arith.constant 0 : i32
    %c0_i32_1 = arith.constant 0 : i32
    return %arg0, %c0_i32, %c0_i32_0 : i32, i32, i32
  }
  func.func @transform_1(%arg0: i32) -> (i32, i32, i32) {
    %c0_i32 = arith.constant 0 : i32
    %c0_i32_0 = arith.constant 0 : i32
    %c0_i32_1 = arith.constant 0 : i32
    return %arg0, %c0_i32, %c0_i32_0 : i32, i32, i32
  }
  func.func @transform_2(%arg0: i32) -> (i32, i32, i32) {
    %c0_i32 = arith.constant 0 : i32
    %c0_i32_0 = arith.constant 0 : i32
    %c0_i32_1 = arith.constant 0 : i32
    return %arg0, %c0_i32, %c0_i32_0 : i32, i32, i32
  }
  func.func @transform_3(%arg0: i32) -> (i32, i32, i32) {
    %c0_i32 = arith.constant 0 : i32
    %c0_i32_0 = arith.constant 0 : i32
    %c0_i32_1 = arith.constant 0 : i32
    return %arg0, %c0_i32, %c0_i32_0 : i32, i32, i32
  }
  func.func @transform_4(%arg0: i32) -> (i32, i32) {
    %c0_i32 = arith.constant 0 : i32
    %c0_i32_0 = arith.constant 0 : i32
    %c0_i32_1 = arith.constant 0 : i32
    return %c0_i32, %c0_i32_0 : i32, i32
  }
  func.func @transform_5(%arg0: i32) -> (i32, i32) {
    %c0_i32 = arith.constant 0 : i32
    %c0_i32_0 = arith.constant 0 : i32
    %c0_i32_1 = arith.constant 0 : i32
    return %c0_i32, %c0_i32_0 : i32, i32
  }
  func.func @transform_6(%arg0: i32) -> (i32, i32) {
    %c0_i32 = arith.constant 0 : i32
    %c0_i32_0 = arith.constant 0 : i32
    %c0_i32_1 = arith.constant 0 : i32
    return %c0_i32, %c0_i32_0 : i32, i32
  }
  func.func @transform_7(%arg0: i32) -> (i32, i32) {
    %c0_i32 = arith.constant 0 : i32
    %c0_i32_0 = arith.constant 0 : i32
    %c0_i32_1 = arith.constant 0 : i32
    return %c0_i32, %c0_i32_0 : i32, i32
  }
  func.func @transform_8(%arg0: i32) -> (i32, i32, i32) {
    %c0_i32 = arith.constant 0 : i32
    %c0_i32_0 = arith.constant 0 : i32
    %c0_i32_1 = arith.constant 0 : i32
    return %arg0, %c0_i32, %c0_i32_0 : i32, i32, i32
  }
}

</mosaic_0001>

<bundles_post_ra>
// kernel: tpu_custom_call.1
= control target key start
LH: loop header
LB: loop body
LE: loop exit
PB: predicated region body
PF: predicated region fallthrough
CT: control target
= control target key end

     0   :  { %s1341_s0 = inlined_call_operand.vmem [shape: f32[2,16,128], index: 0, kind: input, shape index: {}]   ;;  %s1342_s1 = inlined_call_operand.hbm [shape: bf16[2,128,128], index: 1, kind: input, shape index: {}]   ;;  %s1343_s2 = inlined_call_operand.vmem [shape: f32[2,16,1], index: 2, kind: input, shape index: {}]   ;;  %s1344_s3 = inlined_call_operand.vmem [shape: f32[2,1,128], index: 3, kind: input, shape index: {}]   ;;  %s1345_s4 = inlined_call_operand.vmem [shape: f32[1,128], index: 4, kind: input, shape index: {}]   ;;  %s1346_s5 = inlined_call_operand.vmem [shape: f32[1,128], index: 5, kind: input, shape index: {}]   ;;  %s1347_s6 = inlined_call_operand.vmem [shape: f32[1,128], index: 6, kind: input, shape index: {}]   ;;  %s1348_s7 = inlined_call_operand.<no memory space> [shape: f32[1,1], index: 7, kind: input, shape index: {}]   ;;  %s1349_s8 = inlined_call_operand.hbm [shape: f32[2,16,512], index: 8, kind: output, shape index: {}]  }
   0x1   :  { %13 = sst [smem:[#allocation2]] %s1348_s7 }
   0x2   :  { %14 = vsyncpa [#allocation4], 0 }
   0x3   :  { %16 = vsyncpa [#allocation4 + $0x1], 0 }
   0x4   :  { %17 = vsyncpa [#allocation5], 0 }
   0x5   :  { %19 = vsyncpa [#allocation5 + $0x1], 0  ;;  %s1133_s29 = smov 0   ;;  %s1135_s30 = smov 0  }
   0x6   :  { %s1137_s9 = smov 0   ;;  %s1139_s10 = smov 0  }
   0x7 LB: > { %s1154_s7 = sadd.s32 4294967295, %s1078_s10   ;;  %s841_s11 = sadd.s32 4294967294, %s1078_s10   ;;  %s1078_s10 = sphi %s1139_s10, %s1361_s10   ;;  %s1074_s9 = sphi %s1137_s9, %s1360_s9   ;;  %s1070_s30 = sphi %s1135_s30, %s1359_s30   ;;  %s1066_s29 = sphi %s1133_s29, %s1358_s29  }
   0x8   : > { %s1158_s12 = sadd.s32 1, %s1078_s10   ;;  %s58_s13 = sadd.s32 1, %s1074_s9 }
   0x9   : > { %s55_s14 = ssub.s32 %s1078_s10, %s1158_s12  ;;  %p65_p0 = scmp.ne.s32.totalorder %s1074_s9, %s1070_s30 }
   0xa   : > { %p56_p1 = scmp.eq.s32.totalorder %s55_s14, 0  ;;  %p66_p2 = scmp.eq.s32.totalorder %s1078_s10, 0 }
   0xb   : > { %p71_p3 = scmp.ne.s32.totalorder %s1070_s30, %s1066_s29  ;;  %p72_p4 = scmp.eq.s32.totalorder %s1154_s7, 0 }
   0xc   : > { %s1170_s15 = scalar_select %p56_p1, %s1074_s9, %s58_s13  }
   0xd   : > { %p1172_p5 = por %p66_p2, %p65_p0  ;;  %p1176_p6 = por %p72_p4, %p71_p3 }
   0xe   : > { %1350 = sst [smem:[#allocation9_spill]] %s1170_s15  ;;  %p231_p7 = scmp.eq.s32.totalorder %s1154_s7, 1 }
   0xf   : > { %p237_p8 = scmp.eq.s32.totalorder %s841_s11, 1  ;;  %p925_p10 = scmp.lt.s32.totalorder %s1078_s10, 2 }
  0x10   : > { %p1183_p11 = por %p231_p7, %p65_p0  ;;  %s277_s20 = sand.u32 1, %s1074_s9  }
  0x11   : > { %p1187_p12 = por %p237_p8, %p71_p3  ;;  %s899_s21 = sshll.u32 %s1078_s10, 6 }
  0x12   : > { %s844_s22 = sshll.u32 %s277_s20, 6  ;;  %s286_s25 = scalar_lea.hbm %s1342_s1, %s899_s21 }
  0x13   : > { %s287_s26 = sshll.u32 %s286_s25, 4  ;;  %s281_s27 = scalar_lea.vmem [#allocation3], %s844_s22  ;;  %s288_s26 = int_to_ptr.hbm [resolvable:$true] %s287_s26 }
  0x14   : > { %s289_s28 = sshll.u32 %s281_s27, 4  ;;  %p1198_p13 = pnand %p925_p10, %p1172_p5  ;;  %s290_s28 = int_to_ptr.vmem [resolvable:$true] %s289_s28 }
  0x15   : > { %p847_p0 = scmp.ge.s32.totalorder %s1078_s10, 1  ;;  %p311_p1 = scmp.lt.s32.totalorder %s1078_s10, 3 }
  0x16   : > { %s278_s13 = scalar_lea.sflag [#allocation4], %s277_s20  ;;  %s982_s14 = sshra.s32 %s288_s26, 4  ;;  %s983_s14 = int_to_ptr.hbm [resolvable:$true] %s982_s14 }
  0x17   : > { %s984_s15 = scalar_lea.hbm %s983_s14, 64  ;;  %p986_p3 = pneg %p1198_p13 }
  0x18   : > { %p985_p2 = scmp.ne.s32.totalorder %s983_s14, %s984_s15  ;;  %s989_s16 = scalar_lea.hbm %s1342_s1, 128 }
  0x19   : > { %p990_p5 = scmp.lt.s32.totalorder %s983_s14, %s1342_s1  ;;  %p991_p8 = scmp.lt.s32.totalorder %s989_s16, %s984_s15 }
  0x1a   : > { %p987_p4 = pnand %p986_p3, %p985_p2 }
  0x1b   : > { %p992_p10 = por %p991_p8, %p990_p5 }
  0x1c   : > { %p988_p7 = pneg %p987_p4 }
  0x1e   : > { %p993_p9 = pnand %p992_p10, %p988_p7 }
  0x20   : > { %996 = shalt.err (!%p993_p9)
}
  0x21   : > { %s1080_s20 = smov 64   ;;  %s1081_s25 = smov 4  }
  0x22   : > { %920 = dma.hbm_to_vmem [thread:$0]  (!%p1198_p13), %s288_s26, 1024, %s290_s28, %s278_s13, %s1080_s20, %s1080_s20, %s1081_s25  }
  0x23   : > { %p312_p2 = pnand %p847_p0, %p311_p1 }
  0x24   : > { %s1219_s27 = sand.u32 (!%p312_p2), 1, %s1070_s30  }
  0x25   : > { %315 = sbr.rel (%p312_p2) target bundleno = 948 (0x3b4), region = 52  ;;  %s848_s15 = sshll.u32 (!%p312_p2), %s1219_s27, 6 }
  0x26   : > { %s318_s14 = scalar_lea.sflag (!%p312_p2), [#allocation4], %s1219_s27  ;;  %s1225_s21 = scalar_lea.vmem (!%p312_p2), [#allocation3], %s848_s15 }
  0x2a   : > { %1057 = dma.done.wait (%p1176_p6), %s318_s14, 1024  }
  0x2b   : > { %1059 = vsyncadd (%p1176_p6), %s318_s14, 4294966272  ;;  %v909_v0 = vld [vmem:[%s1225_s21 + $0x38] sm:$0xff]  ;;  %v908_v1 = vld [vmem:[%s1225_s21 + $0x30] sm:$0xff]  ;;  %p368_p6 = scmp.lt.s32.totalorder %s1154_s7, 1  ;;  %s1253_s22 = scalar_lea.vmem [#allocation6], %s848_s15  ;;  %v1082_v12 = vmov 0  }
  0x2c   : > { %469 = vmatpush.bf16.xpose.msra.mxu0 %v909_v0  ;;  %488 = vmatpush.bf16.xpose.msra.mxu1 %v909_v0  ;;  %v907_v2 = vld [vmem:[%s1225_s21 + $0x28] sm:$0xff]  ;;  %v906_v3 = vld [vmem:[%s1225_s21 + $0x20] sm:$0xff]  ;;  %v905_v4 = vld [vmem:[%s1225_s21 + $0x18] sm:$0xff]  ;;  %s407_s28 = sld [smem:[#allocation2]]  ;;  %vm572_vm10 = vcmask 130048   ;;  %s732_s25 = sshll.u32 %s1253_s22, 4  ;;  %s733_s25 = int_to_ptr.vmem [resolvable:$true] %s732_s25 }
  0x2d   : > { %679 = vmatpush.bf16.msra.mxu3 %v909_v0  ;;  %s1238_s17 = scalar_select %p368_p6, %s1154_s7, 1  ;;  %v904_v5 = vld [vmem:[%s1225_s21 + $0x10] sm:$0xff]  ;;  %v903_v6 = vld [vmem:[%s1225_s21 + $0x8] sm:$0xff]  ;;  %v902_v8 = vld [vmem:[%s1225_s21] sm:$0xff]  ;;  %964 = vset.pattern.permute.xlu1 %v1082_v12 }
  0x2e   : > { %v967_v11 = vld [vmem:[%s1345_s4] ss:$0 sm:$0xff]  ;;  %965 = vset.pattern.permute.xlu0 %v1082_v12  ;;  %s720_s14 = scalar_lea.sflag [#allocation5], %s1219_s27  ;;  %s1032_s11 = scalar_lea.hbm %s1349_s8, 128 }
  0x2f   : > { %s900_s26 = sshll.u32 %s1238_s17, 4  ;;  %v966_v18 = vld [vmem:[%s1347_s6] ss:$0 sm:$0xff]  ;;  %s380_s16 = scalar_lea.vmem %s1344_s3, %s1238_s17 }
  0x30   : > { %s372_s13 = scalar_lea.vmem %s1341_s0, %s900_s26  ;;  %s377_s24 = scalar_lea.vmem %s1343_s2, %s900_s26  ;;  %v405_v21 = vld [vmem:[%s1346_s5] sm:$0x1] }
  0x31   : > { %680 = vmatpush.bf16.msra.mxu3 %v908_v1  ;;  %v1246_v7 = vld [vmem:[%s372_s13] sm:$0xff]  ;;  %v1249_v9 = vld [vmem:[%s372_s13 + $0x8] sm:$0xff]  ;;  %v420_v22 = vpack.c.bf16 %v405_v21, %v405_v21  ;;  %s910_s17 = sshll.u32 %s1154_s7, 6 }
  0x32   : > { %707 = vst [vmem:[%s1253_s22] sm:$0xff] %v1246_v7  ;;  %v401_v10 = vld [vmem:[%s377_s24] sm:$0xff]  ;;  %v411_v14 = vmul.f32 %v967_v11, %v1246_v7  ;;  %v402_v15 = vld [vmem:[%s377_s24 + $0x8] sm:$0xff]  ;;  %v412_v17 = vmul.f32 %v967_v11, %v1249_v9  ;;  %v485_v19 = vmul.f32 %v966_v18, %v1246_v7  ;;  %v486_v20 = vmul.f32 %v966_v18, %v1249_v9  ;;  %s731_s20 = scalar_lea.hbm %s1349_s8, %s910_s17 }
  0x33   : > { %708 = vst [vmem:[%s1253_s22 + $0x20] sm:$0xff] %v1249_v9  ;;  %vm505_vm0 = vcmp.gt.f32.partialorder %v401_v10, 0.0  ;;  %vm506_vm1 = vcmp.gt.f32.partialorder %v402_v15, 0.0  ;;  %v403_v24 = vld [vmem:[%s380_s16] sm:$0x1]  ;;  %v417_v26 = vstv %s407_s28  ;;  %s734_s15 = sshll.u32 %s731_s20, 4  ;;  %s735_s15 = int_to_ptr.hbm [resolvable:$true] %s734_s15 }
  0x34   : > { %470 = vmatpush.bf16.xpose.msra.mxu0 %v908_v1  ;;  %489 = vmatpush.bf16.xpose.msra.mxu1 %v908_v1  ;;  %v507_v13 = vsel %vm505_vm0, 1, %v1082_v12  ;;  %v508_v16 = vsel %vm506_vm1, 1, %v1082_v12  ;;  %v487_v23 = vpack.c.bf16 %v486_v20, %v485_v19  ;;  %vm654_vm2 = vcmp.gt.f32.partialorder %v403_v24, 0.0  ;;  %s1026_s21 = sshra.s32 %s735_s15, 4  ;;  %s1027_s21 = int_to_ptr.hbm [resolvable:$true] %s1026_s21 }
  0x35   : > { %681 = vmatpush.bf16.msra.mxu3 %v907_v2  ;;  %510 = vperm.xlu1 %964, %v507_v13   ;;  %v655_v27 = vsel %vm654_vm2, 1, %v1082_v12  ;;  %s1028_s7 = scalar_lea.hbm %s1027_s21, 64  ;;  %p1033_p1 = scmp.lt.s32.totalorder %s1027_s21, %s1349_s8 }
  0x36   : > { %413 = vadd.xlane.f32.xlu0 %v411_v14  ;;  %v656_v29 = vperm.slane %v655_v27, 0  ;;  %p1029_p9 = scmp.ne.s32.totalorder %s1027_s21, %s1028_s7  ;;  %p1034_p3 = scmp.lt.s32.totalorder %s1032_s11, %s1028_s7 }
  0x38   : > { %vm657_vm3 = vcmp.eq.s32.totalorder %v656_v29, 1  ;;  %p1030_p13 = pnand %p1029_p9, %p1183_p11  ;;  %p1035_p4 = por %p1034_p3, %p1033_p1 }
  0x39   : > { %682 = vmatpush.bf16.msra.mxu3 %v906_v3 }
  0x3a   : > { %p1031_p0 = pneg %p1030_p13 }
  0x3c   : > { %471 = vmatpush.bf16.xpose.msra.mxu0 %v907_v2  ;;  %490 = vmatpush.bf16.xpose.msra.mxu1 %v907_v2  ;;  %p1036_p7 = pnand %p1035_p4, %p1031_p0 }
  0x3d   : > { %683 = vmatpush.bf16.msra.mxu3 %v905_v4  ;;  %513 = vperm.xlu1 %964, %v508_v16  }
  0x3e   : > { %415 = vadd.xlane.f32.xlu0 %v412_v17 }
  0x41   : > { %684 = vmatpush.bf16.msra.mxu3 %v904_v5 }
  0x44   : > { %472 = vmatpush.bf16.xpose.msra.mxu0 %v906_v3  ;;  %491 = vmatpush.bf16.xpose.msra.mxu1 %v906_v3 }
  0x45   : > { %685 = vmatpush.bf16.msra.mxu3 %v903_v6 }
  0x49   : > { %686 = vmatpush.bf16.msra.mxu3 %v902_v8 }
  0x4c   : > { %473 = vmatpush.bf16.xpose.msra.mxu0 %v905_v4  ;;  %492 = vmatpush.bf16.xpose.msra.mxu1 %v905_v4 }
  0x54   : > { %474 = vmatpush.bf16.xpose.msra.mxu0 %v904_v5  ;;  %493 = vmatpush.bf16.xpose.msra.mxu1 %v904_v5 }
  0x5c   : > { %475 = vmatpush.bf16.xpose.msra.mxu0 %v903_v6  ;;  %494 = vmatpush.bf16.xpose.msra.mxu1 %v903_v6 }
  0x64   : > { %476 = vmatpush.bf16.xpose.msra.mxu0 %v902_v8  ;;  %495 = vmatpush.bf16.xpose.msra.mxu1 %v902_v8 }
  0x6b   : > { %477 = vmatmul.bf16.vlgmr.msra.gmra.mxu0 %v420_v22  ;;  %496 = vmatmul.bf16.vlgmr.msra.gmra.mxu1 %v487_v23  ;;  %v400_v22 = vpack.c.bf16 %v1249_v9, %v1246_v7 }
  0x6d   : > { %912 = vmatpush.bf16.msra.mxu2 %v400_v22  ;;  %604 = vmatpush.bf16.msrb.mxu0 %v400_v22 }
  0x6e   : > { %911 = vmatpush.bf16.msrb.mxu1 %v400_v22 }
  0xa7   : > { %v511_v30 = vpop.permute.xlu1 %510 }
  0xa8   : > { %vm515_vm4 = vcmp.eq.s32.totalorder %v511_v30, 1 }
  0xa9   : > { %v414_v25 = vpop.xlane.xlu0 %413 }
  0xaa   : > { %v418_v28 = vadd.f32 %v417_v26, %v414_v25 }
  0xaf   : > { %v514_v41 = vpop.permute.xlu1 %513 }
  0xb0   : > { %vm516_vm5 = vcmp.eq.s32.totalorder %v514_v41, 1 }
  0xb1   : > { %v416_v35 = vpop.xlane.xlu0 %415 }
  0xb2   : > { %v419_v37 = vadd.f32 %v417_v26, %v416_v35 }
  0xe8   : > { %v478_v31 = vpop.f32.mrf.mxu0  ;;  %v497_v32 = vpop.f32.mrf.mxu1 }
  0xe9   : > { %v502_v33 = vperm.slane %v478_v31, 0  ;;  %v498_v34 = vadd.f32 %v497_v32, %v418_v28 }
  0xeb   : > { %v503_v36 = vadd.f32 %v502_v33, %v498_v34 }
  0xed   : > { %v1279_v38 = vsel %vm657_vm3, %v503_v36, -1e+30  ;;  %v517_v44 = vsel %vm515_vm4, %v503_v36, -1e+30 }
  0xf0   : > { %v480_v39 = vpop.f32.mrf.mxu0  ;;  %v499_v40 = vpop.f32.mrf.mxu1 }
  0xf1   : > { %v500_v42 = vadd.f32 %v499_v40, %v419_v37 }
  0xf3   : > { %v504_v43 = vadd.f32 %v502_v33, %v500_v42 }
  0xf5   : > { %v659_v45 = vsel %vm657_vm3, %v504_v43, -1e+30  ;;  %v518_v46 = vsel %vm516_vm5, %v504_v43, -1e+30 }
  0xf6   : > { %662 = vmax.xlane.f32.xlu0 %v659_v45  ;;  %v519_v47 = vmax.f32 %v517_v44, %v518_v46 }
  0xf8   : > { %v520_v48 = vrot.slane %v519_v47, 4 }
  0xfa   : > { %v521_v49 = vmax.f32 %v519_v47, %v520_v48 }
  0xfc   : > { %v522_v50 = vrot.slane %v521_v49, 2 }
  0xfe   : > { %v523_v51 = vmax.f32 %v521_v49, %v522_v50 }
 0x100   : > { %v524_v52 = vrot.slane %v523_v51, 1 }
 0x102   : > { %v525_v53 = vmax.f32 %v523_v51, %v524_v52 }
 0x104   : > { %v526_v54 = vsub.f32 %v517_v44, %v525_v53  ;;  %v527_v55 = vsub.f32 %v518_v46, %v525_v53 }
 0x106   : > { %v530_v56 = vmul.f32 1.442695, %v527_v55  ;;  %v528_v57 = vmul.f32 1.442695, %v526_v54 }
 0x108   : > { %968 = vpow2.f32 %v530_v56 }
 0x109   : > { %970 = vpow2.f32 %v528_v57 }
 0x10e   : > { %v969_v58 = vpop.eup %968 }
 0x10f   : > { %v971_v59 = vpop.eup %970 }
 0x110   : > { %v532_v60 = vadd.f32 %v971_v59, %v969_v58 }
 0x112   : > { %v533_v61 = vrot.slane %v532_v60, 4 }
 0x114   : > { %v534_v62 = vadd.f32 %v533_v61, %v532_v60 }
 0x116   : > { %v535_v63 = vrot.slane %v534_v62, 2 }
 0x118   : > { %v536_v0 = vadd.f32 %v535_v63, %v534_v62 }
 0x11a   : > { %v537_v1 = vrot.slane %v536_v0, 1 }
 0x11c   : > { %v538_v2 = vadd.f32 %v537_v1, %v536_v0 }
 0x11e   : > { %972 = vrcp.f32 %v538_v2  ;;  %v550_v6 = vand.u32 2147483648, %v538_v2  ;;  %v548_v10 = vand.u32 2147483647, %v538_v2  ;;  %vm544_vm7 = vweird.f32 %v538_v2 }
 0x120   : > { %v551_v12 = vor.u32 1.1754944e-38, %v550_v6  ;;  %vm549_vm9 = vcmp.eq.f32.partialorder %v548_v10, 8.507059e+37 }
 0x124   : > { %v973_v3 = vpop.eup %972 }
 0x125   : > { %v540_v4 = vmul.f32 %v973_v3, %v538_v2  ;;  %vm545_vm6 = vweird.f32 %v973_v3 }
 0x126   : > { %vm546_vm8 = vmor %vm544_vm7, %vm545_vm6 }
 0x127   : > { %v541_v5 = vsub.f32 1.0, %v540_v4 }
 0x129   : > { %v542_v8 = vmul.f32 %v973_v3, %v541_v5 }
 0x12b   : > { %v543_v11 = vadd.f32 %v973_v3, %v542_v8 }
 0x12d   : > { %v547_v13 = vsel %vm546_vm8, %v973_v3, %v543_v11 }
 0x12e   : > { %v552_v14 = vsel %vm549_vm9, %v551_v12, %v547_v13 }
 0x12f   : > { %v553_v15 = vmul.f32 %v971_v59, %v552_v14  ;;  %v554_v16 = vmul.f32 %v969_v58, %v552_v14 }
 0x131   : > { %v555_v17 = vpack.c.bf16 %v554_v16, %v553_v15 }
 0x133   : > { %556 = vxpose.xlu2.c.b16.start.end [1/1] (short) %v555_v17, 128 }
 0x169   : > { %v663_v18 = vpop.xlane.xlu0 %662 }
 0x16a   : > { %v665_v19 = vsub.f32 %v659_v45, %v663_v18 }
 0x16c   : > { %v668_v20 = vmul.f32 1.442695, %v665_v19 }
 0x16e   : > { %974 = vpow2.f32 %v668_v20 }
 0x174   : > { %v1281_v21 = vpop.eup %974 }
 0x175   : > { %672 = vadd.xlane.f32.xlu0 %v1281_v21 }
 0x1d4   : > { %v564_v23 = vpop.trf.xlu2 }
 0x1d5   : > { %886 = vmatmul.msk.bf16.vlgmr.msrb.gmra.mxu0 %vm572_vm10, %v564_v23 }
 0x1e4   : > { %v565_v24 = vpop.trf.xlu2 }
 0x1e5   : > { %887 = vmatmul.msk.bf16.vlgmr.msrb.gmra.mxu1 %vm572_vm10, %v565_v24 }
 0x1e8   : > { %v673_v59 = vpop.xlane.xlu0 %672 }
 0x1f4   : > { %v566_v25 = vpop.trf.xlu2 }
 0x1f5   : > { %888 = vmatmul.msk.bf16.vlgmr.msra.gmra.mxu2 %vm572_vm10, %v566_v25 }
 0x204   : > { %v567_v26 = vpop.trf.xlu2 }
 0x205   : > { %889 = vmatmul.msk.bf16.gmra.mxu2 %vm572_vm10, %v567_v26 }
 0x214   : > { %660 = vmax.xlane.f32.xlu2 %v1279_v38  ;;  %v568_v27 = vpop.trf.xlu2 }
 0x215   : > { %890 = vmatmul.msk.bf16.gmra.mxu2 %vm572_vm10, %v568_v27 }
 0x224   : > { %v569_v28 = vpop.trf.xlu2 }
 0x225   : > { %891 = vmatmul.msk.bf16.gmra.mxu2 %vm572_vm10, %v569_v28 }
 0x234   : > { %v570_v29 = vpop.trf.xlu2 }
 0x235   : > { %892 = vmatmul.msk.bf16.gmra.mxu2 %vm572_vm10, %v570_v29 }
 0x244   : > { %v571_v30 = vpop.trf.xlu2 }
 0x245   : > { %893 = vmatmul.msk.bf16.gmra.mxu2 %vm572_vm10, %v571_v30 }
 0x252   : > { %v606_v54 = vpop.f32.mrf.mxu0 }
 0x25a   : > { %v608_v57 = vpop.f32.mrf.mxu0 }
 0x25b   : > { %v646_v58 = vpack.c.bf16 %v608_v57, %v606_v54 }
 0x278   : > { %v616_v31 = vpop.f32.mrf.mxu2 }
 0x280   : > { %v618_v32 = vpop.f32.mrf.mxu2 }
 0x281   : > { %v648_v33 = vpack.c.bf16 %v618_v32, %v616_v31 }
 0x287   : > { %v661_v34 = vpop.xlane.xlu2 %660 }
 0x288   : > { %v664_v35 = vsub.f32 %v1279_v38, %v661_v34  ;;  %v621_v36 = vpop.f32.mrf.mxu2  ;;  %v611_v38 = vpop.f32.mrf.mxu1 }
 0x28a   : > { %v666_v37 = vmul.f32 1.442695, %v664_v35 }
 0x28c   : > { %976 = vpow2.f32 %v666_v37 }
 0x28d   : > { %978 = vrcp.f32 %v673_v59 }
 0x290   : > { %v623_v39 = vpop.f32.mrf.mxu2  ;;  %v613_v55 = vpop.f32.mrf.mxu1 }
 0x291   : > { %v649_v40 = vpack.c.bf16 %v623_v39, %v621_v36  ;;  %v647_v56 = vpack.c.bf16 %v613_v55, %v611_v38 }
 0x292   : > { %v977_v41 = vpop.eup %976 }
 0x293   : > { %670 = vadd.xlane.f32.xlu1 %v977_v41  ;;  %v979_v61 = vpop.eup %978 }
 0x294   : > { %v677_v0 = vmul.f32 %v979_v61, %v1281_v21 }
 0x298   : > { %v626_v42 = vpop.f32.mrf.mxu2 }
 0x2a0   : > { %v628_v43 = vpop.f32.mrf.mxu2 }
 0x2a1   : > { %v650_v53 = vpack.c.bf16 %v628_v43, %v626_v42 }
 0x2a8   : > { %v631_v44 = vpop.f32.mrf.mxu2 }
 0x2b0   : > { %v633_v45 = vpop.f32.mrf.mxu2 }
 0x2b1   : > { %v651_v52 = vpack.c.bf16 %v633_v45, %v631_v44 }
 0x2b8   : > { %v636_v46 = vpop.f32.mrf.mxu2 }
 0x2c0   : > { %v638_v47 = vpop.f32.mrf.mxu2 }
 0x2c1   : > { %v652_v51 = vpack.c.bf16 %v638_v47, %v636_v46 }
 0x2c8   : > { %v641_v48 = vpop.f32.mrf.mxu2 }
 0x2d0   : > { %v643_v49 = vpop.f32.mrf.mxu2 }
 0x2d1   : > { %v653_v50 = vpack.c.bf16 %v643_v49, %v641_v48 }
 0x2d3   : > { %693 = vmatpush.bf16.msrb.mxu3 %v653_v50 }
 0x2d7   : > { %694 = vmatpush.bf16.msrb.mxu3 %v652_v51 }
 0x2db   : > { %695 = vmatpush.bf16.msrb.mxu3 %v651_v52 }
 0x2df   : > { %696 = vmatpush.bf16.msrb.mxu3 %v650_v53 }
 0x2e3   : > { %697 = vmatpush.bf16.msrb.mxu3 %v649_v40 }
 0x2e7   : > { %698 = vmatpush.bf16.msrb.mxu3 %v648_v33 }
 0x2eb   : > { %699 = vmatpush.bf16.msrb.mxu3 %v647_v56 }
 0x2ef   : > { %700 = vmatpush.bf16.msrb.mxu3 %v646_v58 }
 0x306   : > { %v671_v60 = vpop.xlane.xlu1 %670 }
 0x307   : > { %980 = vrcp.f32 %v671_v60 }
 0x30d   : > { %v981_v62 = vpop.eup %980 }
 0x30e   : > { %v676_v63 = vmul.f32 %v981_v62, %v977_v41 }
 0x310   : > { %v678_v1 = vpack.c.bf16 %v677_v0, %v676_v63 }
 0x312   : > { %687 = vmatmul.bf16.vlgmr.msra.gmra.mxu3 %v678_v1 }
 0x322   : > { %701 = vmatmul.bf16.vlgmr.msrb.gmra.mxu3 %v678_v1 }
 0x395   : > { %v688_v2 = vpop.f32.mrf.mxu3 }
 0x396   : > { %709 = vst [vmem:[%s1253_s22 + $0x8] sm:$0xff] %v688_v2  ;;  %v711_v3 = vmul.f32 %v688_v2, %v1246_v7 }
 0x398   : > { %713 = vst [vmem:[%s1253_s22 + $0x10] sm:$0xff] %v711_v3 }
 0x39d   : > { %v690_v4 = vpop.f32.mrf.mxu3 }
 0x39e   : > { %710 = vst [vmem:[%s1253_s22 + $0x28] sm:$0xff] %v690_v4  ;;  %v712_v5 = vmul.f32 %v690_v4, %v1249_v9 }
 0x3a0   : > { %714 = vst [vmem:[%s1253_s22 + $0x30] sm:$0xff] %v712_v5 }
 0x3a5   : > { %v702_v6 = vpop.f32.mrf.mxu3 }
 0x3a6   : > { %v715_v8 = vmul.f32 %v702_v6, %v1246_v7 }
 0x3a8   : > { %717 = vst [vmem:[%s1253_s22 + $0x18] sm:$0xff] %v715_v8 }
 0x3ad   : > { %v704_v10 = vpop.f32.mrf.mxu3 }
 0x3ae   : > { %v716_v11 = vmul.f32 %v704_v10, %v1249_v9 }
 0x3b0   : > { %718 = vst [vmem:[%s1253_s22 + $0x38] sm:$0xff] %v716_v11 }
 0x3b1   : > { %1039 = shalt.err (!%p1036_p7)
}
 0x3b2   : > { %s1083_s27 = smov 512   ;;  %s1084_s22 = smov 32  }
 0x3b3   : > { %915 = dma.vmem_to_hbm [thread:$0]  (%p1183_p11), %s733_s25, 1024, %s735_s15, %s720_s14, %s1083_s27, %s1083_s27, %s1084_s22  }
 0x3b4 PF: > { %s749_s17 = sand.u32 1, %s1066_s29   ;;  %p1356_p5 = scmp.ge.s32.totalorder %s1078_s10, 2 }
 0x3b5   : > { %s750_s23 = scalar_lea.sflag [#allocation5], %s749_s17 }
 0x3b6   : > { %p922_p8 = pnand %p1356_p5, %p1187_p12 }
 0x3b8   : > { %p923_p10 = pneg %p922_p8 }
 0x3ba   : > { %1061 = dma.done.wait (%p923_p10), %s750_s23, 1024  }
 0x3bb   : > { %1063 = vsyncadd (%p923_p10), %s750_s23, 4294966272  ;;  %s1357_s24 = sld [smem:[#allocation9_spill]]  ;;  %p22_p2 = scmp.ge.s32.totalorder %s1158_s12, 4  }
 0x3bc   : > { %s1358_s29 = smov %s1070_s30  ;;  %s1359_s30 = smov %s1074_s9 }
 0x3bd   : > { %s1361_s10 = smov %s1158_s12  ;;  %24 = sbr.rel (!%p22_p2) target bundleno = 7 (0x7), region = 106 }
 0x3c1   : > { %s1360_s9 = smov %s1357_s24 }
 0x3c2   :  { %756 = vsyncpa [#allocation4], 1 }
 0x3c3   :  { %758 = vsyncpa [#allocation4 + $0x1], 1 }
 0x3c4   :  { %759 = vsyncpa [#allocation5], 1 }
 0x3c5   :  { %761 = vsyncpa [#allocation5 + $0x1], 1 }

</bundles_post_ra>
